<compile_context>
chip_gen: v6e
topology: v6e:2x2x1
jax: 0.10.0
libtpu: 0.0.40
codegen_flags: <defaults>
</compile_context>

<pallas_src>
import math

import jax
import jax.numpy as jnp
from jax.experimental import pallas as pl
from jax.experimental.pallas import tpu as pltpu

LANE = 128
SUBLANE = 8


def _round_up(x, m):
    return (x + m - 1) // m * m


def _cdiv(a, b):
    return -(-a // b)


# ---------------------------------------------------------------------------
# Pallas kernel: the full MLP chain for one (Cin, TN) channels-first tile.
# ---------------------------------------------------------------------------
def _make_mlp_kernel(relu_flags, compute_dtype):
    n_layers = len(relu_flags)

    def kernel(x_ref, *refs):
        out_ref = refs[-1]
        h = x_ref[...].astype(compute_dtype)            # (Cin, TN)
        for li in range(n_layers):
            w = refs[2 * li][...]                       # (Cout, Cin) compute_dtype
            s = refs[2 * li + 1][...]                   # (Cout, 1)   f32
            h = jnp.dot(w, h, preferred_element_type=jnp.float32)   # (Cout, TN)
            h = h + s                                   # folded bias (+ BN), f32
            if relu_flags[li]:
                h = jnp.maximum(h, 0.0)
            if li < n_layers - 1:
                h = h.astype(compute_dtype)             # feed next MXU in bf16
        out_ref[...] = h.astype(out_ref.dtype)

    return kernel


# ---------------------------------------------------------------------------
# Sizing helpers.
# ---------------------------------------------------------------------------
def _default_vmem_limit():
    # Stay well under the smallest per-TensorCore VMEM (v7x: 64 MiB/TC).  The
    # value reported by get_tpu_info() may be per-chip, so clamp hard.
    try:
        phys = int(pltpu.get_tpu_info().vmem_capacity_bytes)
    except Exception:
        phys = 128 << 20
    return int(min(max(phys // 2, 32 << 20), 48 << 20))


def _choose_tn(nsp, per_col_bytes, tile_budget, max_tn=8192):
    """Pick the lane-tile size over the flattened point axis.

    Returns (tn, n_pad).  tn is either the full extent (small problems, no
    padding, always legal) or a multiple of 128 (lane-dense unmasked stores),
    capped at max_tn; n_pad minimizes last-tile waste.
    """
    target = tile_budget // max(per_col_bytes, 1)
    target = max(LANE, min(target // LANE * LANE, max_tn))
    n128 = _round_up(max(nsp, 1), LANE)
    if target >= n128:
        return nsp, nsp                    # one tile per batch element
    ntiles = _cdiv(n128, target)
    tn = _round_up(_cdiv(n128, ntiles), LANE)
    return tn, tn * ntiles


# ---------------------------------------------------------------------------
# pallas_call wrapper.
# ---------------------------------------------------------------------------
def mlp_pallas(x, weights, shifts, relu_flags, *, tn, compute_dtype,
               out_dtype, vmem_limit_bytes):
    B, cin, n_pad = x.shape
    assert n_pad % tn == 0
    cout = weights[-1].shape[0]
    grid = (B, n_pad // tn)

    in_specs = [pl.BlockSpec((None, cin, tn), lambda b, n: (b, 0, n))]
    args = [x]
    for w, s in zip(weights, shifts):
        # Resident weights / folded shifts: constant block index, full shape.
        in_specs.append(pl.BlockSpec(w.shape, lambda b, n: (0, 0)))
        in_specs.append(pl.BlockSpec(s.shape, lambda b, n: (0, 0)))
        args += [w, s]

    return pl.pallas_call(
        _make_mlp_kernel(tuple(relu_flags), compute_dtype),
        out_shape=jax.ShapeDtypeStruct((B, cout, n_pad), out_dtype),
        grid_spec=pltpu.PrefetchScalarGridSpec(
            num_scalar_prefetch=0,
            grid=grid,
            in_specs=in_specs,
            out_specs=pl.BlockSpec((None, cout, tn), lambda b, n: (b, 0, n)),
        ),
        compiler_params=pltpu.CompilerParams(
            dimension_semantics=("parallel", "parallel"),
            vmem_limit_bytes=vmem_limit_bytes),
    )(*args)


# ---------------------------------------------------------------------------
# Parameters mirroring the PyTorch module (Conv2d 1x1 [+ BatchNorm2d] [+ ReLU]).
# ---------------------------------------------------------------------------
def init_mlp_params(key, in_channel, mlp, relu, bn):
    dims = [in_channel] + list(mlp)           # module does mlp.insert(0, in_channel)
    layers = []
    keys = jax.random.split(key, len(dims) - 1)
    for i in range(len(dims) - 1):
        cin, cout = dims[i], dims[i + 1]
        kk = jax.random.split(keys[i], 6)
        layer = {
            'w': jax.random.normal(kk[0], (cout, cin), jnp.float32) / math.sqrt(cin),
            'b': 0.01 * jax.random.normal(kk[1], (cout,), jnp.float32),
            'relu': bool(relu[i]),
            'bn': bool(bn[i]),
        }
        if layer['bn']:
            layer['gamma'] = 1.0 + 0.1 * jax.random.normal(kk[2], (cout,), jnp.float32)
            layer['beta'] = 0.1 * jax.random.normal(kk[3], (cout,), jnp.float32)
            layer['mean'] = 0.1 * jax.random.normal(kk[4], (cout,), jnp.float32)
            layer['var'] = jnp.abs(1.0 + 0.1 * jax.random.normal(kk[5], (cout,), jnp.float32))
        layers.append(layer)
    return layers


def _fold_layers(layers, weight_dtype, eps=1e-5):
    """Fold eval-mode BatchNorm + conv bias into (weight, shift).

    Weights keep the native Conv2d layout (Cout, Cin); no padding, no
    transpose.  Shifts are (Cout, 1) f32 (per-channel, broadcast over lanes).
    """
    # TODO(synk): training-mode BatchNorm (batch statistics) has no clean
    # per-tile Pallas equivalent; eval-mode running-stat BN is folded instead.
    weights, shifts, relus = [], [], []
    for L in layers:
        w = L['w']                             # (Cout, Cin) == Conv2d.weight[..., 0, 0]
        b = L['b']
        if L['bn']:
            scale = L['gamma'] / jnp.sqrt(L['var'] + eps)
            w = w * scale[:, None]
            b = (b - L['mean']) * scale + L['beta']
        weights.append(w.astype(weight_dtype))
        shifts.append(b.reshape(-1, 1).astype(jnp.float32))
        relus.append(L['relu'])
    return weights, shifts, relus


# ---------------------------------------------------------------------------
# Forward pass (channels-first in / out, like the PyTorch module).
# ---------------------------------------------------------------------------
def _mlp_ref(layers, points, eps=1e-5):
    x = jnp.moveaxis(points, 1, -1)
    for L in layers:
        x = jnp.einsum('...i,oi->...o', x, L['w']) + L['b']
        if L['bn']:
            scale = L['gamma'] / jnp.sqrt(L['var'] + eps)
            x = (x - L['mean']) * scale + L['beta']
        if L['relu']:
            x = jnp.maximum(x, 0.0)
    return jnp.moveaxis(x, -1, 1)


def mlp_forward(layers, points, *, squeeze=False, use_kernel=True,
                compute_dtype=jnp.bfloat16, out_dtype=None):
    """points: channels-first [B, C, N] (or [B, C, H, W]); returns [B, D, ...]."""
    if squeeze:
        points = points[..., None]             # PyTorch: unsqueeze(-1) for Conv2d
    if not use_kernel:
        out = _mlp_ref(layers, points)
    else:
        B, cin = points.shape[0], points.shape[1]
        spatial = points.shape[2:]
        nsp = 1
        for s in spatial:
            nsp *= int(s)
        # Contiguous reshape only -- no transpose, no HBM copy of consequence.
        x = points.reshape(B, cin, nsp)

        weights, shifts, relus = _fold_layers(layers, compute_dtype)
        cout = weights[-1].shape[0]
        cmax = max(max(w.shape) for w in weights)
        if out_dtype is None:
            out_dtype = points.dtype            # match module semantics by default

        x_bytes = jnp.dtype(points.dtype).itemsize
        o_bytes = jnp.dtype(out_dtype).itemsize
        # Resident weight/shift footprint (Pallas double-buffers every input).
        w_bytes = 2 * sum(int(w.size) * w.dtype.itemsize + int(s.size) * 4
                          for w, s in zip(weights, shifts))
        vmem_limit = _default_vmem_limit()
        tile_budget = int(min(max(vmem_limit - w_bytes - (6 << 20), 2 << 20), 24 << 20))
        # per-lane-column bytes: double-buffered in/out tiles + live f32 temps.
        per_col = (2 * cin * x_bytes + 2 * cout * o_bytes
                   + 4 * _round_up(cmax, SUBLANE) * 4)
        tn, n_pad = _choose_tn(nsp, per_col, tile_budget)

        if n_pad != nsp:
            x = jnp.pad(x, ((0, 0), (0, 0), (0, n_pad - nsp)))

        out_pad = mlp_pallas(x, weights, shifts, relus, tn=tn,
                             compute_dtype=compute_dtype, out_dtype=out_dtype,
                             vmem_limit_bytes=vmem_limit)
        out = out_pad[:, :, :nsp] if n_pad != nsp else out_pad
        out = out.reshape((B, cout) + tuple(spatial))
    if squeeze:
        out = out[..., 0]
    return out


if __name__ == "__main__":
    B, N = 2, 16
    in_channel = 16
    mlp = [64, 64, 32]
    relu = [True, True, False]
    bn = [True, False, False]

    key = jax.random.PRNGKey(0)
    k_pts, k_par = jax.random.split(key)
    points = jax.random.normal(k_pts, (B, in_channel, N), dtype=jnp.float32)
    layers = init_mlp_params(k_par, in_channel, mlp, relu, bn)

    out = mlp_forward(layers, points, use_kernel=True)
    out = jax.block_until_ready(out)
    assert out.shape == (B, mlp[-1], N), out.shape

    ref = mlp_forward(layers, points, use_kernel=False)
    ref = jax.block_until_ready(ref)
    err = float(jnp.max(jnp.abs(out - ref)))
    # bf16 MXU operands with f32 accumulation; activations are O(1).
    assert err < 5e-2, f"kernel/reference mismatch: max abs err = {err}"

    # also exercise the `squeeze=True` path of the module ([B, C, N] -> unsqueeze)
    out_sq = mlp_forward(layers, points, squeeze=True, use_kernel=True)
    out_sq = jax.block_until_ready(out_sq)
    assert out_sq.shape == (B, mlp[-1], N), out_sq.shape

    print("KERNEL_OK")
</pallas_src>

<mosaic_0001>
module attributes {stable_mosaic.version = 11 : i64} {
  func.func @kernel(%arg0: i32, %arg1: i32, %arg2: memref<1x16x16xf32, #tpu.memory_space<vmem>>, %arg3: memref<64x16xbf16, #tpu.memory_space<vmem>>, %arg4: memref<64x1xf32, #tpu.memory_space<vmem>>, %arg5: memref<64x64xbf16, #tpu.memory_space<vmem>>, %arg6: memref<64x1xf32, #tpu.memory_space<vmem>>, %arg7: memref<32x64xbf16, #tpu.memory_space<vmem>>, %arg8: memref<32x1xf32, #tpu.memory_space<vmem>>, %arg9: memref<1x32x16xf32, #tpu.memory_space<vmem>>) attributes {dimension_semantics = [#tpu.dimension_semantics<parallel>, #tpu.dimension_semantics<parallel>], iteration_bounds = array<i64: 2, 1>, scalar_prefetch = 0 : i64, scratch_operands = 0 : i64, tpu.core_type = #tpu.core_type<tc>, window_params = [{transform_indices = @transform_0, window_bounds = array<i64: 1, 16, 16>}, {pipeline_mode = #tpu.pipeline_mode<synchronous>, transform_indices = @transform_1, window_bounds = array<i64: 64, 16>}, {pipeline_mode = #tpu.pipeline_mode<synchronous>, transform_indices = @transform_2, window_bounds = array<i64: 64, 1>}, {pipeline_mode = #tpu.pipeline_mode<synchronous>, transform_indices = @transform_3, window_bounds = array<i64: 64, 64>}, {pipeline_mode = #tpu.pipeline_mode<synchronous>, transform_indices = @transform_4, window_bounds = array<i64: 64, 1>}, {pipeline_mode = #tpu.pipeline_mode<synchronous>, transform_indices = @transform_5, window_bounds = array<i64: 32, 64>}, {pipeline_mode = #tpu.pipeline_mode<synchronous>, transform_indices = @transform_6, window_bounds = array<i64: 32, 1>}, {transform_indices = @transform_7, window_bounds = array<i64: 1, 32, 16>}]} {
    %c0 = arith.constant 0 : index
    %c0_0 = arith.constant 0 : index
    %c0_1 = arith.constant 0 : index
    %0 = vector.load %arg2[%c0, %c0_0, %c0_1] : memref<1x16x16xf32, #tpu.memory_space<vmem>>, vector<1x16x16xf32>
    %1 = vector.shape_cast %0 : vector<1x16x16xf32> to vector<16x16xf32>
    %2 = arith.truncf %1 : vector<16x16xf32> to vector<16x16xbf16>
    %c0_2 = arith.constant 0 : index
    %c0_3 = arith.constant 0 : index
    %3 = vector.load %arg3[%c0_2, %c0_3] : memref<64x16xbf16, #tpu.memory_space<vmem>>, vector<64x16xbf16>
    %c0_4 = arith.constant 0 : index
    %c0_5 = arith.constant 0 : index
    %4 = vector.load %arg4[%c0_4, %c0_5] : memref<64x1xf32, #tpu.memory_space<vmem>>, vector<64x1xf32>
    %cst = arith.constant dense<0.000000e+00> : vector<64x16xf32>
    %5 = tpu.matmul %3, %2, %cst {dimension_numbers = #tpu.dot_dimension_numbers<[1], [0], [0], [1], [0, 0, 1, 1], [], []>} : vector<64x16xbf16>, vector<16x16xbf16>, vector<64x16xf32> -> vector<64x16xf32>
    %6 = vector.broadcast %4 : vector<64x1xf32> to vector<64x16xf32>
    %7 = arith.addf %5, %6 : vector<64x16xf32>
    %cst_6 = arith.constant 0.000000e+00 : f32
    %8 = vector.broadcast %cst_6 : f32 to vector<64x16xf32>
    %9 = arith.maximumf %7, %8 : vector<64x16xf32>
    %10 = arith.truncf %9 : vector<64x16xf32> to vector<64x16xbf16>
    %c0_7 = arith.constant 0 : index
    %c0_8 = arith.constant 0 : index
    %11 = vector.load %arg5[%c0_7, %c0_8] : memref<64x64xbf16, #tpu.memory_space<vmem>>, vector<64x64xbf16>
    %c0_9 = arith.constant 0 : index
    %c0_10 = arith.constant 0 : index
    %12 = vector.load %arg6[%c0_9, %c0_10] : memref<64x1xf32, #tpu.memory_space<vmem>>, vector<64x1xf32>
    %cst_11 = arith.constant dense<0.000000e+00> : vector<64x16xf32>
    %13 = tpu.matmul %11, %10, %cst_11 {dimension_numbers = #tpu.dot_dimension_numbers<[1], [0], [0], [1], [0, 0, 1, 1], [], []>} : vector<64x64xbf16>, vector<64x16xbf16>, vector<64x16xf32> -> vector<64x16xf32>
    %14 = vector.broadcast %12 : vector<64x1xf32> to vector<64x16xf32>
    %15 = arith.addf %13, %14 : vector<64x16xf32>
    %cst_12 = arith.constant 0.000000e+00 : f32
    %16 = vector.broadcast %cst_12 : f32 to vector<64x16xf32>
    %17 = arith.maximumf %15, %16 : vector<64x16xf32>
    %18 = arith.truncf %17 : vector<64x16xf32> to vector<64x16xbf16>
    %c0_13 = arith.constant 0 : index
    %c0_14 = arith.constant 0 : index
    %19 = vector.load %arg7[%c0_13, %c0_14] : memref<32x64xbf16, #tpu.memory_space<vmem>>, vector<32x64xbf16>
    %c0_15 = arith.constant 0 : index
    %c0_16 = arith.constant 0 : index
    %20 = vector.load %arg8[%c0_15, %c0_16] : memref<32x1xf32, #tpu.memory_space<vmem>>, vector<32x1xf32>
    %cst_17 = arith.constant dense<0.000000e+00> : vector<32x16xf32>
    %21 = tpu.matmul %19, %18, %cst_17 {dimension_numbers = #tpu.dot_dimension_numbers<[1], [0], [0], [1], [0, 0, 1, 1], [], []>} : vector<32x64xbf16>, vector<64x16xbf16>, vector<32x16xf32> -> vector<32x16xf32>
    %22 = vector.broadcast %20 : vector<32x1xf32> to vector<32x16xf32>
    %23 = arith.addf %21, %22 : vector<32x16xf32>
    %c0_18 = arith.constant 0 : index
    %c0_19 = arith.constant 0 : index
    %c0_20 = arith.constant 0 : index
    %24 = vector.load %arg9[%c0_18, %c0_19, %c0_20] : memref<1x32x16xf32, #tpu.memory_space<vmem>>, vector<1x32x16xf32>
    %25 = vector.shape_cast %24 : vector<1x32x16xf32> to vector<32x16xf32>
    %26 = vector.shape_cast %23 : vector<32x16xf32> to vector<1x32x16xf32>
    tpu.vector_store %arg9[%c0_18, %c0_19, %c0_20], %26 {strides = array<i32>} : memref<1x32x16xf32, #tpu.memory_space<vmem>>, vector<1x32x16xf32>,
    return
  }
  func.func @transform_0(%arg0: i32, %arg1: i32) -> (i32, i32, i32) {
    %c0_i32 = arith.constant 0 : i32
    %c0_i32_0 = arith.constant 0 : i32
    return %arg0, %c0_i32, %arg1 : i32, i32, i32
  }
  func.func @transform_1(%arg0: i32, %arg1: i32) -> (i32, i32) {
    %c0_i32 = arith.constant 0 : i32
    %c0_i32_0 = arith.constant 0 : i32
    %c0_i32_1 = arith.constant 0 : i32
    return %c0_i32, %c0_i32_0 : i32, i32
  }
  func.func @transform_2(%arg0: i32, %arg1: i32) -> (i32, i32) {
    %c0_i32 = arith.constant 0 : i32
    %c0_i32_0 = arith.constant 0 : i32
    %c0_i32_1 = arith.constant 0 : i32
    return %c0_i32, %c0_i32_0 : i32, i32
  }
  func.func @transform_3(%arg0: i32, %arg1: i32) -> (i32, i32) {
    %c0_i32 = arith.constant 0 : i32
    %c0_i32_0 = arith.constant 0 : i32
    %c0_i32_1 = arith.constant 0 : i32
    return %c0_i32, %c0_i32_0 : i32, i32
  }
  func.func @transform_4(%arg0: i32, %arg1: i32) -> (i32, i32) {
    %c0_i32 = arith.constant 0 : i32
    %c0_i32_0 = arith.constant 0 : i32
    %c0_i32_1 = arith.constant 0 : i32
    return %c0_i32, %c0_i32_0 : i32, i32
  }
  func.func @transform_5(%arg0: i32, %arg1: i32) -> (i32, i32) {
    %c0_i32 = arith.constant 0 : i32
    %c0_i32_0 = arith.constant 0 : i32
    %c0_i32_1 = arith.constant 0 : i32
    return %c0_i32, %c0_i32_0 : i32, i32
  }
  func.func @transform_6(%arg0: i32, %arg1: i32) -> (i32, i32) {
    %c0_i32 = arith.constant 0 : i32
    %c0_i32_0 = arith.constant 0 : i32
    %c0_i32_1 = arith.constant 0 : i32
    return %c0_i32, %c0_i32_0 : i32, i32
  }
  func.func @transform_7(%arg0: i32, %arg1: i32) -> (i32, i32, i32) {
    %c0_i32 = arith.constant 0 : i32
    %c0_i32_0 = arith.constant 0 : i32
    return %arg0, %c0_i32, %arg1 : i32, i32, i32
  }
}

</mosaic_0001>

<bundles_post_ra>
// kernel: tpu_custom_call.1
= control target key start
LH: loop header
LB: loop body
LE: loop exit
PB: predicated region body
PF: predicated region fallthrough
CT: control target
= control target key end

     0   :  { %s1018_s24 = smov 0   ;;  %s1020_s25 = smov 0   ;;  %s1159_s0 = inlined_call_operand.vmem [shape: f32[2,16,16], index: 0, kind: input, shape index: {}]   ;;  %s1160_s1 = inlined_call_operand.vmem [shape: bf16[64,16], index: 1, kind: input, shape index: {}]   ;;  %s1161_s2 = inlined_call_operand.vmem [shape: f32[64,1], index: 2, kind: input, shape index: {}]   ;;  %s1162_s3 = inlined_call_operand.vmem [shape: bf16[64,64], index: 3, kind: input, shape index: {}]   ;;  %s1163_s4 = inlined_call_operand.vmem [shape: f32[64,1], index: 4, kind: input, shape index: {}]   ;;  %s1164_s5 = inlined_call_operand.vmem [shape: bf16[32,64], index: 5, kind: input, shape index: {}]   ;;  %s1165_s6 = inlined_call_operand.vmem [shape: f32[32,1], index: 6, kind: input, shape index: {}]   ;;  %s1166_s7 = inlined_call_operand.vmem [shape: f32[2,32,16], index: 7, kind: output, shape index: {}]  }
   0x1   :  { %s1022_s26 = smov 0  }
   0x2 LB: > { %s29_s27 = sadd.s32 1, %s971_s25  ;;  %p830_p0 = scmp.ge.s32.totalorder %s975_s26, 1  ;;  %s975_s26 = sphi %s1022_s26, %s17_s26   ;;  %s971_s25 = sphi %s1020_s25, %s1168_s25   ;;  %s967_s24 = sphi %s1018_s24, %s1167_s24  }
   0x3   : > { %p31_p1 = scmp.ge.s32.totalorder %s29_s27, 2  ;;  %p256_p2 = scmp.lt.s32.totalorder %s975_s26, 3 }
   0x5   : > { %s1170_s27 = smov (%p31_p1, %s29_s27), 0  ;;  %p257_p3 = pnand %p830_p0, %p256_p2 }
   0x6   : > { %p294_p4 = scmp.lt.s32.totalorder (!%p257_p3), %s967_s24, 1 }
   0x7   : > { %260 = sbr.rel (%p257_p3) target bundleno = 678 (0x2a6), region = 48 }
   0xc   : > { %v943_v0 = vld [vmem:[%s1160_s1] sm:$0xff]   ;;  %vm390_vm0 = vcmask 130048   ;;  %s1172_s24 = smov (!%p294_p4, %s967_s24), 1  ;;  %v977_v1 = vmov 0   ;;  %v328_v2 = vld [vmem:[%s1161_s2 + $0x30] sm:$0xff]  ;;  %v329_v6 = vld [vmem:[%s1161_s2 + $0x38] sm:$0xff] }
   0xd   : > { %880 = vmatprep.mubr.msk.bf16.mxu0 %vm390_vm0, %v943_v0  ;;  %s857_s30 = sshll.u32 %s1172_s24, 4  ;;  %941 = vset.pattern.permute.xlu0 %v977_v1  ;;  %v326_v3 = vld [vmem:[%s1161_s2 + $0x20] sm:$0xff]  ;;  %v327_v8 = vld [vmem:[%s1161_s2 + $0x28] sm:$0xff]  ;;  %v945_v10 = vld [vmem:[%s1160_s1 + $0x10] sm:$0xff]   ;;  %vm556_vm1 = vcmask 523264   ;;  %s858_s12 = sshll.u32 %s1172_s24, 5 }
   0xe   : > { %942 = vset.pattern.permute.xlu1 %v977_v1  ;;  %s301_s14 = scalar_lea.vmem %s1159_s0, %s857_s30  ;;  %362 = vperm.xlu0 %941, %v328_v2   ;;  %v944_v9 = vld [vmem:[%s1160_s1 + $0x8] sm:$0xff]   ;;  %v324_v11 = vld [vmem:[%s1161_s2 + $0x10] sm:$0xff]  ;;  %v325_v12 = vld [vmem:[%s1161_s2 + $0x18] sm:$0xff]  ;;  %s309_s15 = scalar_lea.vmem %s1166_s7, %s858_s12 }
   0xf   : > { %352 = vperm.xlu1 %942, %v326_v3   ;;  %v311_v4 = vld [vmem:[%s301_s14] sm:$0xff]  ;;  %v312_v5 = vld [vmem:[%s301_s14 + $0x8] sm:$0xff]  ;;  %v946_v15 = vld [vmem:[%s1160_s1 + $0x18] sm:$0xff]  }
  0x10   : > { %v313_v7 = vpack.c.bf16 %v312_v5, %v311_v4  ;;  %v322_v13 = vld [vmem:[%s1161_s2] sm:$0xff]  ;;  %v323_v14 = vld [vmem:[%s1161_s2 + $0x8] sm:$0xff]  ;;  %v494_v16 = vld [vmem:[%s1163_s4 + $0x30] sm:$0xff] }
  0x11   : > { %v495_v17 = vld [vmem:[%s1163_s4 + $0x38] sm:$0xff]  ;;  %v492_v18 = vld [vmem:[%s1163_s4 + $0x20] sm:$0xff]  ;;  %v493_v19 = vld [vmem:[%s1163_s4 + $0x28] sm:$0xff] }
  0x12   : > { %878 = vmatprep.subr.bf16.mxu0 %v313_v7  ;;  %367 = vperm.xlu0 %941, %v329_v6   ;;  %v490_v20 = vld [vmem:[%s1163_s4 + $0x10] sm:$0xff]  ;;  %v491_v21 = vld [vmem:[%s1163_s4 + $0x18] sm:$0xff]  ;;  %v488_v22 = vld [vmem:[%s1163_s4] sm:$0xff] }
  0x13   : > { %879 = vmatpush3.bf16.msra.mxu0 %v313_v7  ;;  %357 = vperm.xlu1 %942, %v327_v8   ;;  %v489_v23 = vld [vmem:[%s1163_s4 + $0x8] sm:$0xff]  ;;  %v650_v24 = vld [vmem:[%s1165_s6] sm:$0xff]  ;;  %v652_v26 = vld [vmem:[%s1165_s6 + $0x10] sm:$0xff] }
  0x14   : > { %v651_v25 = vld [vmem:[%s1165_s6 + $0x8] sm:$0xff]  ;;  %v653_v27 = vld [vmem:[%s1165_s6 + $0x18] sm:$0xff]  ;;  %v947_v28 = vld [vmem:[%s1162_s3] sm:$0xff]  }
  0x15   : > { %896 = vmatprep.mubr.msk.bf16.mxu1 %vm556_vm1, %v947_v28  ;;  %v948_v1 = vld [vmem:[%s1162_s3 + $0x8] sm:$0xff]   ;;  %v949_v2 = vld [vmem:[%s1162_s3 + $0x10] sm:$0xff]   ;;  %v950_v3 = vld [vmem:[%s1162_s3 + $0x18] sm:$0xff]  }
  0x16   : > { %881 = vmatmul.mubr.msk.bf16.vlgmr.msra.gmra.mxu0 %vm390_vm0, %v944_v9  ;;  %342 = vperm.xlu0 %941, %v324_v11   ;;  %v951_v4 = vld [vmem:[%s1164_s5] sm:$0xff]  }
  0x17   : > { %884 = vmatprep.mubr.msk.bf16.mxu0 %vm390_vm0, %v945_v10  ;;  %347 = vperm.xlu1 %942, %v325_v12  }
  0x1a   : > { %332 = vperm.xlu0 %941, %v322_v13  }
  0x1b   : > { %337 = vperm.xlu1 %942, %v323_v14  }
  0x1e   : > { %885 = vmatmul.mubr.msk.bf16.gmra.mxu0 %vm390_vm0, %v946_v15  ;;  %528 = vperm.xlu0 %941, %v494_v16  }
  0x1f   : > { %533 = vperm.xlu1 %942, %v495_v17   ;;  %912 = vmatprep.mubr.msk.bf16.mxu0 %vm556_vm1, %v951_v4 }
  0x22   : > { %518 = vperm.xlu0 %941, %v492_v18  }
  0x23   : > { %523 = vperm.xlu1 %942, %v493_v19  }
  0x26   : > { %508 = vperm.xlu0 %941, %v490_v20  }
  0x27   : > { %513 = vperm.xlu1 %942, %v491_v21  }
  0x2a   : > { %498 = vperm.xlu0 %941, %v488_v22  }
  0x2b   : > { %503 = vperm.xlu1 %942, %v489_v23  }
  0x2e   : > { %656 = vperm.xlu0 %941, %v650_v24  }
  0x2f   : > { %661 = vperm.xlu1 %942, %v651_v25  }
  0x32   : > { %666 = vperm.xlu0 %941, %v652_v26  }
  0x33   : > { %671 = vperm.xlu1 %942, %v653_v27  }
  0x89   : > { %v363_v31 = vpop.permute.xlu0 %362 }
  0x8a   : > { %v353_v29 = vpop.permute.xlu1 %352 }
  0x8d   : > { %v368_v36 = vpop.permute.xlu0 %367 }
  0x8e   : > { %v358_v34 = vpop.permute.xlu1 %357 }
  0x91   : > { %v343_v44 = vpop.permute.xlu0 %342 }
  0x92   : > { %v348_v40 = vpop.permute.xlu1 %347 }
  0x95   : > { %v333_v58 = vpop.permute.xlu0 %332 }
  0x96   : > { %v338_v54 = vpop.permute.xlu1 %337 }
  0x99   : > { %v529_v7 = vpop.permute.xlu0 %528 }
  0x9a   : > { %v534_v5 = vpop.permute.xlu1 %533 }
  0x9d   : > { %v519_v12 = vpop.permute.xlu0 %518 }
  0x9e   : > { %v524_v10 = vpop.permute.xlu1 %523 }
  0xa1   : > { %v509_v20 = vpop.permute.xlu0 %508 }
  0xa2   : > { %v514_v16 = vpop.permute.xlu1 %513 }
  0xd6   : > { %v882_v30 = vpop.f32.mrf.mxu0 }
  0xd7   : > { %v446_v50 = vadd.f32 %v882_v30, %v343_v44  ;;  %v504_v30 = vpop.permute.xlu1 %503 }
  0xd8   : > { %v437_v32 = vpop.f32.mrf.mxu0 }
  0xd9   : > { %v470_v59 = vmax.f32 %v446_v50, 0.0  ;;  %v438_v60 = vadd.f32 %v437_v32, %v333_v58 }
  0xda   : > { %v883_v33 = vpop.f32.mrf.mxu0 }
  0xdb   : > { %v449_v46 = vadd.f32 %v883_v33, %v348_v40  ;;  %v468_v63 = vmax.f32 %v438_v60, 0.0 }
  0xdc   : > { %v440_v35 = vpop.f32.mrf.mxu0 }
  0xdd   : > { %v471_v55 = vmax.f32 %v449_v46, 0.0  ;;  %v441_v56 = vadd.f32 %v440_v35, %v338_v54 }
  0xde   : > { %v886_v37 = vpop.f32.mrf.mxu0 }
  0xdf   : > { %v462_v39 = vadd.f32 %v886_v37, %v363_v31  ;;  %v477_v61 = vpack.c.bf16 %v471_v55, %v470_v59  ;;  %v469_v62 = vmax.f32 %v441_v56, 0.0 }
  0xe0   : > { %v453_v38 = vpop.f32.mrf.mxu0 }
  0xe1   : > { %v454_v42 = vadd.f32 %v453_v38, %v353_v29  ;;  %v474_v47 = vmax.f32 %v462_v39, 0.0  ;;  %v476_v0 = vpack.c.bf16 %v469_v62, %v468_v63 }
  0xe2   : > { %v887_v41 = vpop.f32.mrf.mxu0 }
  0xe3   : > { %v465_v43 = vadd.f32 %v887_v41, %v368_v36  ;;  %v472_v51 = vmax.f32 %v454_v42, 0.0  ;;  %v952_v41 = vld [vmem:[%s1164_s5 + $0x8] sm:$0xff]  }
  0xe4   : > { %v456_v45 = vpop.f32.mrf.mxu0 }
  0xe5   : > { %v475_v48 = vmax.f32 %v465_v43, 0.0  ;;  %v457_v49 = vadd.f32 %v456_v45, %v358_v34  ;;  %v499_v34 = vpop.permute.xlu0 %498  ;;  %v662_v43 = vpop.permute.xlu1 %661 }
  0xe7   : > { %v473_v52 = vmax.f32 %v457_v49, 0.0  ;;  %v479_v53 = vpack.c.bf16 %v475_v48, %v474_v47 }
  0xe9   : > { %v478_v57 = vpack.c.bf16 %v473_v52, %v472_v51  ;;  %888 = vmatprep.subr.bf16.mxu1 %v479_v53  ;;  %v657_v42 = vpop.permute.xlu0 %656  ;;  %v672_v49 = vpop.permute.xlu1 %671 }
  0xea   : > { %889 = vmatpush3.bf16.msra.mxu1 %v479_v53 }
  0xeb   : > { %890 = vmatprep.subr.bf16.mxu1 %v478_v57 }
  0xed   : > { %v667_v44 = vpop.permute.xlu0 %666 }
  0xee   : > { %891 = vmatpush3.bf16.msra.mxu1 %v478_v57 }
  0xef   : > { %892 = vmatprep.subr.bf16.mxu1 %v477_v61 }
  0xf2   : > { %893 = vmatpush3.bf16.msra.mxu1 %v477_v61 }
  0xf3   : > { %894 = vmatprep.subr.bf16.mxu1 %v476_v0 }
  0xf6   : > { %895 = vmatpush3.bf16.msra.mxu1 %v476_v0 }
  0xf9   : > { %897 = vmatmul.mubr.msk.bf16.vlgmr.msra.gmra.mxu1 %vm556_vm1, %v948_v1 }
  0xfa   : > { %900 = vmatprep.mubr.msk.bf16.mxu1 %vm556_vm1, %v949_v2 }
 0x101   : > { %901 = vmatmul.mubr.msk.bf16.gmra.mxu1 %vm556_vm1, %v950_v3 }
 0x1b9   : > { %v898_v6 = vpop.f32.mrf.mxu1 }
 0x1ba   : > { %v612_v26 = vadd.f32 %v898_v6, %v509_v20 }
 0x1bb   : > { %v603_v8 = vpop.f32.mrf.mxu1 }
 0x1bc   : > { %v636_v35 = vmax.f32 %v612_v26, 0.0  ;;  %v604_v36 = vadd.f32 %v603_v8, %v499_v34 }
 0x1bd   : > { %v899_v9 = vpop.f32.mrf.mxu1 }
 0x1be   : > { %v615_v22 = vadd.f32 %v899_v9, %v514_v16  ;;  %v634_v39 = vmax.f32 %v604_v36, 0.0 }
 0x1bf   : > { %v606_v11 = vpop.f32.mrf.mxu1 }
 0x1c0   : > { %v637_v31 = vmax.f32 %v615_v22, 0.0  ;;  %v607_v32 = vadd.f32 %v606_v11, %v504_v30 }
 0x1c1   : > { %v902_v13 = vpop.f32.mrf.mxu1 }
 0x1c2   : > { %v628_v15 = vadd.f32 %v902_v13, %v529_v7  ;;  %v643_v37 = vpack.c.bf16 %v637_v31, %v636_v35  ;;  %v635_v38 = vmax.f32 %v607_v32, 0.0 }
 0x1c3   : > { %v619_v14 = vpop.f32.mrf.mxu1 }
 0x1c4   : > { %v620_v18 = vadd.f32 %v619_v14, %v519_v12  ;;  %v640_v23 = vmax.f32 %v628_v15, 0.0  ;;  %v642_v40 = vpack.c.bf16 %v635_v38, %v634_v39 }
 0x1c5   : > { %v903_v17 = vpop.f32.mrf.mxu1 }
 0x1c6   : > { %v631_v19 = vadd.f32 %v903_v17, %v534_v5  ;;  %v638_v27 = vmax.f32 %v620_v18, 0.0 }
 0x1c7   : > { %v622_v21 = vpop.f32.mrf.mxu1 }
 0x1c8   : > { %v641_v24 = vmax.f32 %v631_v19, 0.0  ;;  %v623_v25 = vadd.f32 %v622_v21, %v524_v10 }
 0x1ca   : > { %v645_v28 = vpack.c.bf16 %v641_v24, %v640_v23  ;;  %v639_v29 = vmax.f32 %v623_v25, 0.0 }
 0x1cc   : > { %v644_v33 = vpack.c.bf16 %v639_v29, %v638_v27  ;;  %904 = vmatprep.subr.bf16.mxu0 %v645_v28 }
 0x1cd   : > { %905 = vmatpush3.bf16.msra.mxu0 %v645_v28 }
 0x1ce   : > { %906 = vmatprep.subr.bf16.mxu0 %v644_v33 }
 0x1d1   : > { %907 = vmatpush3.bf16.msra.mxu0 %v644_v33 }
 0x1d2   : > { %908 = vmatprep.subr.bf16.mxu0 %v643_v37 }
 0x1d5   : > { %909 = vmatpush3.bf16.msra.mxu0 %v643_v37 }
 0x1d6   : > { %910 = vmatprep.subr.bf16.mxu0 %v642_v40 }
 0x1d9   : > { %911 = vmatpush3.bf16.msra.mxu0 %v642_v40 }
 0x1dc   : > { %913 = vmatmul.mubr.msk.bf16.vlgmr.msra.gmra.mxu0 %vm556_vm1, %v952_v41 }
 0x29c   : > { %v914_v45 = vpop.f32.mrf.mxu0 }
 0x29d   : > { %v733_v46 = vadd.f32 %v914_v45, %v667_v44 }
 0x29e   : > { %v724_v47 = vpop.f32.mrf.mxu0 }
 0x29f   : > { %741 = vst.msk [vmem:[%s309_s15 + $0x10] sm:$0xff] %vm390_vm0, %v733_v46  ;;  %v725_v48 = vadd.f32 %v724_v47, %v657_v42 }
 0x2a0   : > { %v915_v50 = vpop.f32.mrf.mxu0 }
 0x2a1   : > { %739 = vst.msk [vmem:[%s309_s15] sm:$0xff] %vm390_vm0, %v725_v48  ;;  %v736_v51 = vadd.f32 %v915_v50, %v672_v49 }
 0x2a2   : > { %v727_v52 = vpop.f32.mrf.mxu0 }
 0x2a3   : > { %742 = vst.msk [vmem:[%s309_s15 + $0x18] sm:$0xff] %vm390_vm0, %v736_v51  ;;  %v728_v53 = vadd.f32 %v727_v52, %v662_v43 }
 0x2a5   : > { %740 = vst.msk [vmem:[%s309_s15 + $0x8] sm:$0xff] %vm390_vm0, %v728_v53 }
 0x2a6 PF: > { %s17_s26 = sadd.s32 1, %s975_s26   ;;  %s1167_s24 = smov %s971_s25 }
 0x2a7   : > { %p14_p5 = scmp.ge.s32.totalorder %s17_s26, 4   ;;  %s1168_s25 = smov %s1170_s27 }
 0x2a9   :  { %16 = sbr.rel (!%p14_p5) target bundleno = 2 (0x2), region = 78 }

</bundles_post_ra>
